<compile_context>
chip_gen: v7x
topology: tpu7x:2x2x1
jax: 0.10.0
libtpu: 0.0.40
codegen_flags: <defaults>
</compile_context>

<pallas_src>
import functools

import numpy as np
import jax
import jax.numpy as jnp
from jax.experimental import pallas as pl
from jax.experimental.pallas import tpu as pltpu


# ----------------------------- helpers -----------------------------

def _round_up(n, m):
    return ((n + m - 1) // m) * m


def _pad(a, shape):
    pads = [(0, t - s) for s, t in zip(a.shape, shape)]
    return jnp.pad(a, pads)


def _vmem_budget():
    """Generation-aware VMEM budget: ~75% of physical VMEM (~96 MiB on the
    128 MiB v5e/v6e parts, ~48 MiB on v7x's 64 MiB).  Falls back to a
    v7x-safe 48 MiB if the hardware query is unavailable."""
    cap = 64 * 1024 * 1024
    try:
        cap = int(pltpu.get_tpu_info().vmem_capacity_bytes) or cap
    except Exception:
        pass
    return (cap // 4) * 3


def _pick_block_b(B, L, D_in, H_pad, C8, C_pad, budget):
    """Largest batch tile Bt whose per-grid-step working set fits `budget`,
    capped so the grid has >= 2 steps (v7x megacore sharding + DMA overlap)."""
    # double-buffered streamed blocks (bf16 x/adj, f32 lens/esm-bias/out)
    stream = 2 * (L * D_in * 2 + L * L * 2 + 8 * 128 * 4 + 2 * C_pad * 4)
    # in-kernel intermediates (f32 + bf16 copies where both transiently exist)
    interm = (L * H_pad * (4 + 2)              # h0 (f32 transient + bf16)
              + L * H_pad * (4 + 2)            # pe (f32 transient + bf16 kept)
              + C8 * H_pad * (4 + 2)           # le f32 + scaled bf16 copy
              + 4 * C8 * L * 4 + C8 * L * 2    # scores / s / p / att (+ att bf16)
              + C8 * H_pad * 4                 # ctx
              + 6 * H_pad * 4)                 # pooled / q / denom / misc
    per_b = int((stream + interm) * 1.4)       # ~40% headroom (layout pad / spill)
    # grid-invariant params, conservatively counted double-buffered
    fixed = 2 * (D_in * H_pad * 2 + H_pad * H_pad * 2 + C8 * H_pad * 4
                 + 2 * H_pad * 4 + C8 * 4)
    bt = max(1, (budget - fixed) // max(per_b, 1))
    bt = min(bt, B)
    if B >= 2:
        bt = min(bt, -(-B // 2))               # keep at least two grid steps
    return int(bt)


# ----------------------------- Pallas kernel -----------------------------

def _total_kernel(scale,
                  x_ref, adj_ref, len_ref, bias_ref,          # per-protein blocks
                  lh_ref, rsum_ref,                           # hoisted label terms
                  w1_ref, b1_ref, w2_ref, wout_ref,           # shared params
                  out_ref):
    Bt, L, D_in = x_ref.shape
    H_pad = w1_ref.shape[1]
    C8 = lh_ref.shape[0]
    C_pad = out_ref.shape[2]

    lens = len_ref[...]                                        # [Bt, 1, 1] f32

    # ---- 1. Protein GCN: pe = relu(A_norm @ (x @ W1 + b1)), kept in bf16 ----
    # Precondition: padded residue rows of adj are all-zero, so pe is exactly
    # zero there and no post-ReLU residue mask is needed.
    h0 = (jnp.dot(x_ref[...].reshape(Bt * L, D_in), w1_ref[...],
                  preferred_element_type=jnp.float32)
          + b1_ref[...]).reshape(Bt, L, H_pad).astype(jnp.bfloat16)
    pe = jnp.maximum(
        jnp.einsum('bls,bsh->blh', adj_ref[...], h0,
                   preferred_element_type=jnp.float32), 0.0
    ).astype(jnp.bfloat16)                                     # [Bt, L, H_pad]

    # ---- 2. Label features via the hoisted rank-1 split:
    #   (lrel @ (lemb + 1⊗pooled)) @ W2 + b2
    #     = (lrel@lemb@W2 + b2)             <- lh_ref (hoisted in the wrapper)
    #     + rowsum(lrel) ⊗ (pooled @ W2)    <- only pooled@W2 stays in-kernel
    denom = jnp.maximum(lens, 1.0)                             # [Bt, 1, 1]
    pooled = (jnp.sum(pe, axis=1, keepdims=True, dtype=jnp.float32)
              / denom)                                         # [Bt, 1, H_pad]
    q = jnp.dot(pooled.reshape(Bt, H_pad).astype(jnp.bfloat16), w2_ref[...],
                preferred_element_type=jnp.float32)            # [Bt, H_pad]
    le = jnp.maximum(lh_ref[...] + rsum_ref[...] * q[:, None, :],
                     0.0)                                      # [Bt, C8, H_pad] f32

    # ---- 3. Protein-label attention: labels on sublanes, residues on lanes ----
    le_b = (le * scale).astype(jnp.bfloat16)     # fold 1/sqrt(H) into the one cast
    scores = jnp.einsum('bch,blh->bcl', le_b, pe,
                        preferred_element_type=jnp.float32)    # [Bt, C8, L]
    iota_l = jax.lax.broadcasted_iota(jnp.int32, (Bt, 1, L), 2).astype(jnp.float32)
    s = scores + jnp.where(iota_l < lens, 0.0, -1e9)
    s = s - jnp.max(s, axis=-1, keepdims=True)
    p = jnp.exp(s)
    att = p * pl.reciprocal(jnp.sum(p, axis=-1, keepdims=True), approx=True)

    # ---- 4. Head: ctx = att @ pe ; logits = sum_h(ctx * le * w_out) + esm bias ----
    ctx = jnp.einsum('bcl,blh->bch', att.astype(jnp.bfloat16), pe,
                     preferred_element_type=jnp.float32)       # [Bt, C8, H_pad]
    logit = jnp.sum(ctx * le * wout_ref[...], axis=-1)         # [Bt, C8]
    if C_pad > C8:                                             # lane-dense store
        logit = jnp.concatenate(
            [logit, jnp.zeros((Bt, C_pad - C8), jnp.float32)], axis=-1)
    out_ref[...] = jax.nn.sigmoid(logit.reshape(Bt, 1, C_pad) + bias_ref[...])


# ----------------------------- wrapper -----------------------------

def total_model_forward(x, adj, mask2d, esm_rep, lrel,
                        W1, b1, lemb, W2, b2, Wrep, wout, *, block_b=None):
    """Fused TotalModel forward.

    Precondition on `adj` (dense, row-normalized [B, L, L]): rows for padded
    residues (index >= protein length) must be all-zero (self-loops only on
    valid nodes), so the in-kernel post-ReLU residue mask can be skipped.
    """
    B, L, D_in = x.shape
    C = lrel.shape[0]
    H = W1.shape[1]

    H_pad = _round_up(H, 128)          # lane-padded hidden width
    C8 = _round_up(C, 8)               # in-kernel label width (sublane axis)
    C_pad = _round_up(C, 128)          # lane-dense output width
    # TODO(synk): for very large label sets, add a C grid axis instead of
    # keeping all of [Bt, C8, H_pad] / [Bt, C8, L] resident per step.

    # --- shared params: lane-pad H, bf16 for MXU operands ---
    W1p = _pad(W1, (D_in, H_pad)).astype(jnp.bfloat16)
    b1p = _pad(b1, (1, H_pad)).astype(jnp.float32)
    W2p = _pad(W2, (H_pad, H_pad)).astype(jnp.bfloat16)
    woutp = _pad(wout, (1, H_pad)).astype(jnp.float32)

    # --- hoisted, batch-independent label-graph terms (one-time f32 XLA) ---
    #   (lrel @ (lemb + 1⊗pooled)) @ W2 + b2
    #     = (lrel @ lemb @ W2 + b2)  +  rowsum(lrel) ⊗ (pooled @ W2)
    le_hoist = _pad((lrel @ lemb) @ W2 + b2, (C8, H_pad)).astype(jnp.float32)
    lrel_rsum = _pad(lrel.sum(axis=-1, keepdims=True), (C8, 1)).astype(jnp.float32)

    # --- hoisted ESM projection: one XLA GEMM instead of per-step MXU passes ---
    esm_bias = (esm_rep @ Wrep).astype(jnp.float32)            # [B, C]

    # --- batch tiling: generation-aware VMEM budget, grid >= 2, pad B to Bt ---
    budget = _vmem_budget()
    Bt = block_b if block_b is not None else _pick_block_b(
        B, L, D_in, H_pad, C8, C_pad, budget)
    B_pad = _round_up(B, Bt)
    grid = (B_pad // Bt,)

    x_b = _pad(x, (B_pad, L, D_in)).astype(jnp.bfloat16)
    adj_b = _pad(adj, (B_pad, L, L)).astype(jnp.bfloat16)
    lens3 = _pad(mask2d.sum(axis=-1).reshape(B, 1, 1),
                 (B_pad, 1, 1)).astype(jnp.float32)
    bias3 = _pad(esm_bias.reshape(B, 1, C), (B_pad, 1, C_pad))

    bmap3 = lambda b: (b, 0, 0)
    # Grid-invariant params: constant index_map => fetched once by the pipeline.
    inv = lambda shp: pl.BlockSpec(shp, lambda b: (0, 0))

    out = pl.pallas_call(
        functools.partial(_total_kernel, 1.0 / float(H) ** 0.5),
        out_shape=jax.ShapeDtypeStruct((B_pad, 1, C_pad), jnp.float32),
        grid=grid,
        in_specs=[
            pl.BlockSpec((Bt, L, D_in), bmap3),        # x              (bf16)
            pl.BlockSpec((Bt, L, L), bmap3),           # adj            (bf16)
            pl.BlockSpec((Bt, 1, 1), bmap3),           # lengths        (f32)
            pl.BlockSpec((Bt, 1, C_pad), bmap3),       # hoisted esm    (f32)
            inv((C8, H_pad)),                          # lrel@lemb@W2+b2(f32)
            inv((C8, 1)),                              # rowsum(lrel)   (f32)
            inv((D_in, H_pad)),                        # W1             (bf16)
            inv((1, H_pad)),                           # b1             (f32)
            inv((H_pad, H_pad)),                       # W2             (bf16)
            inv((1, H_pad)),                           # w_out          (f32)
        ],
        out_specs=pl.BlockSpec((Bt, 1, C_pad), bmap3),
        compiler_params=pltpu.CompilerParams(
            dimension_semantics=("parallel",),
            vmem_limit_bytes=int(budget)),
    )(x_b, adj_b, lens3, bias3, le_hoist, lrel_rsum, W1p, b1p, W2p, woutp)

    return out.reshape(B_pad, C_pad)[:B, :C]


# ------------------------- pure-JAX reference -------------------------

def reference_forward(x, adj, mask2d, esm_rep, lrel,
                      W1, b1, lemb, W2, b2, Wrep, wout):
    B, L, _ = x.shape
    H = W1.shape[1]
    m = mask2d[:, :, None]                                           # [B, L, 1]
    h0 = x @ W1 + b1
    pe = jnp.maximum(jnp.einsum('bls,bsh->blh', adj, h0), 0.0) * m   # [B, L, H]
    denom = jnp.maximum(m.sum(axis=1, keepdims=True), 1.0)
    pooled = pe.sum(axis=1, keepdims=True) / denom                   # [B, 1, H]
    lf = lemb[None] + pooled                                         # [B, C, H]
    lf = jnp.einsum('cd,bdh->bch', lrel, lf)
    le = jnp.maximum(lf @ W2 + b2, 0.0)                              # [B, C, H]
    scores = jnp.einsum('blh,bch->blc', pe, le) / (H ** 0.5)
    s = scores + (1.0 - m) * (-1e9)
    s = s - s.max(axis=1, keepdims=True)
    p = jnp.exp(s)
    att = p / p.sum(axis=1, keepdims=True)                           # [B, L, C]
    ctx = jnp.einsum('blc,blh->bch', att, pe)
    fused = ctx * le
    logit1 = jnp.einsum('bch,h->bc', fused, wout[0])
    logit2 = esm_rep @ Wrep
    return jax.nn.sigmoid(logit1 + logit2)


# ------------------------------ main ------------------------------

if __name__ == "__main__":
    # Small shapes consistent with the forward pass
    B, L = 2, 16                 # proteins, max residues per protein
    D_seq, D_esm = 8, 24         # per-residue seq features + ESM token features
    D_in = D_seq + D_esm
    H = 32                       # hidden width
    C = 8                        # number of labels (GO terms)
    D_rep = 16                   # per-protein ESM representation
    lengths = [16, 12]           # residues per protein (graph sizes)
    N = sum(lengths)

    key = jax.random.PRNGKey(0)
    ks = jax.random.split(key, 12)

    # ---- raw PyG-style inputs ----
    seq_nodes = 0.1 * jax.random.normal(ks[0], (N, D_seq), jnp.float32)
    esm_token = 0.1 * jax.random.normal(ks[1], (N, D_esm), jnp.float32)
    esm_repr = 0.1 * jax.random.normal(ks[2], (B, D_rep), jnp.float32)
    batch_vec = jnp.array([0] * lengths[0] + [1] * lengths[1], dtype=jnp.int32)

    # chain edges within each graph (both directions)
    offsets_py = [0, lengths[0]]
    src_l, dst_l = [], []
    for b, Lb in enumerate(lengths):
        off = offsets_py[b]
        for i in range(Lb - 1):
            src_l += [off + i, off + i + 1]
            dst_l += [off + i + 1, off + i]
    edge_index = jnp.array([src_l, dst_l], dtype=jnp.int32)

    r = jax.random.uniform(ks[3], (C, C))
    lrel = (r > 0.5).astype(jnp.float32)
    lrel = jnp.maximum(lrel, lrel.T) + jnp.eye(C, dtype=jnp.float32)
    lrel = lrel / lrel.sum(axis=-1, keepdims=True)

    # ---- deterministic parameters ----
    W1 = 0.1 * jax.random.normal(ks[4], (D_in, H), jnp.float32)
    b1 = 0.1 * jax.random.normal(ks[5], (1, H), jnp.float32)
    lemb = 0.1 * jax.random.normal(ks[6], (C, H), jnp.float32)
    W2 = 0.1 * jax.random.normal(ks[7], (H, H), jnp.float32)
    b2 = 0.1 * jax.random.normal(ks[8], (1, H), jnp.float32)
    Wrep = 0.1 * jax.random.normal(ks[9], (D_rep, C), jnp.float32)
    wout = 0.1 * jax.random.normal(ks[10], (1, H), jnp.float32)

    # ---- glue: densify PyG-style inputs to the kernel layout ----
    # TODO(synk): the sparse edge_index -> dense adjacency scatter has no clean
    # in-kernel Pallas equivalent; it is done once here in plain JAX.
    offsets = jnp.array(offsets_py, dtype=jnp.int32)
    local = jnp.arange(N, dtype=jnp.int32) - offsets[batch_vec]

    x_nodes = jnp.concatenate([seq_nodes, esm_token], axis=-1)          # [N, D_in]
    x = jnp.zeros((B, L, D_in), jnp.float32).at[batch_vec, local].set(x_nodes)

    mask2d = (jnp.arange(L)[None, :] < jnp.array(lengths)[:, None]).astype(jnp.float32)

    src, dst = edge_index
    be = batch_vec[src]
    ls = src - offsets[be]
    ld = dst - offsets[be]
    adj = jnp.zeros((B, L, L), jnp.float32).at[be, ls, ld].set(1.0)
    adj = adj + jnp.eye(L, dtype=jnp.float32)[None] * mask2d[:, :, None]  # self-loops on valid nodes
    adj = adj / jnp.maximum(adj.sum(axis=-1, keepdims=True), 1.0)         # row-normalize (padded rows stay zero)

    # ---- run Pallas kernel ----
    out = total_model_forward(x, adj, mask2d, esm_repr, lrel,
                              W1, b1, lemb, W2, b2, Wrep, wout)
    out = jax.block_until_ready(out)

    # ---- validate against pure-JAX f32 reference ----
    ref = reference_forward(x, adj, mask2d, esm_repr, lrel,
                            W1, b1, lemb, W2, b2, Wrep, wout)
    ref = jax.block_until_ready(ref)
    assert out.shape == (B, C)
    # Tolerance accounts for bf16 MXU operands + approx reciprocal vs f32 reference.
    np.testing.assert_allclose(np.asarray(out), np.asarray(ref), rtol=1e-2, atol=1e-2)

    print("KERNEL_OK")
</pallas_src>

<mosaic_0001>
module attributes {stable_mosaic.version = 11 : i64} {
  func.func @_total_kernel(%arg0: i32, %arg1: memref<1x16x32xbf16, #tpu.memory_space<vmem>>, %arg2: memref<1x16x16xbf16, #tpu.memory_space<vmem>>, %arg3: memref<1x1x1xf32, #tpu.memory_space<vmem>>, %arg4: memref<1x1x128xf32, #tpu.memory_space<vmem>>, %arg5: memref<8x128xf32, #tpu.memory_space<vmem>>, %arg6: memref<8x1xf32, #tpu.memory_space<vmem>>, %arg7: memref<32x128xbf16, #tpu.memory_space<vmem>>, %arg8: memref<1x128xf32, #tpu.memory_space<vmem>>, %arg9: memref<128x128xbf16, #tpu.memory_space<vmem>>, %arg10: memref<1x128xf32, #tpu.memory_space<vmem>>, %arg11: memref<1x1x128xf32, #tpu.memory_space<vmem>>) attributes {dimension_semantics = [#tpu.dimension_semantics<parallel>], iteration_bounds = array<i64: 2>, scalar_prefetch = 0 : i64, scratch_operands = 0 : i64, tpu.core_type = #tpu.core_type<tc>, window_params = [{transform_indices = @transform_0, window_bounds = array<i64: 1, 16, 32>}, {transform_indices = @transform_1, window_bounds = array<i64: 1, 16, 16>}, {transform_indices = @transform_2, window_bounds = array<i64: 1, 1, 1>}, {transform_indices = @transform_3, window_bounds = array<i64: 1, 1, 128>}, {pipeline_mode = #tpu.pipeline_mode<synchronous>, transform_indices = @transform_4, window_bounds = array<i64: 8, 128>}, {pipeline_mode = #tpu.pipeline_mode<synchronous>, transform_indices = @transform_5, window_bounds = array<i64: 8, 1>}, {pipeline_mode = #tpu.pipeline_mode<synchronous>, transform_indices = @transform_6, window_bounds = array<i64: 32, 128>}, {pipeline_mode = #tpu.pipeline_mode<synchronous>, transform_indices = @transform_7, window_bounds = array<i64: 1, 128>}, {pipeline_mode = #tpu.pipeline_mode<synchronous>, transform_indices = @transform_8, window_bounds = array<i64: 128, 128>}, {pipeline_mode = #tpu.pipeline_mode<synchronous>, transform_indices = @transform_9, window_bounds = array<i64: 1, 128>}, {transform_indices = @transform_10, window_bounds = array<i64: 1, 1, 128>}]} {
    %c0 = arith.constant 0 : index
    %c0_0 = arith.constant 0 : index
    %c0_1 = arith.constant 0 : index
    %0 = vector.load %arg3[%c0, %c0_0, %c0_1] : memref<1x1x1xf32, #tpu.memory_space<vmem>>, vector<1x1x1xf32>
    %c0_2 = arith.constant 0 : index
    %c0_3 = arith.constant 0 : index
    %c0_4 = arith.constant 0 : index
    %1 = vector.load %arg1[%c0_2, %c0_3, %c0_4] : memref<1x16x32xbf16, #tpu.memory_space<vmem>>, vector<1x16x32xbf16>
    %2 = vector.shape_cast %1 : vector<1x16x32xbf16> to vector<16x32xbf16>
    %c0_5 = arith.constant 0 : index
    %c0_6 = arith.constant 0 : index
    %3 = vector.load %arg7[%c0_5, %c0_6] : memref<32x128xbf16, #tpu.memory_space<vmem>>, vector<32x128xbf16>
    %cst = arith.constant dense<0.000000e+00> : vector<16x128xf32>
    %4 = tpu.matmul %2, %3, %cst {dimension_numbers = #tpu.dot_dimension_numbers<[1], [0], [0], [1], [0, 0, 1, 1], [], []>} : vector<16x32xbf16>, vector<32x128xbf16>, vector<16x128xf32> -> vector<16x128xf32>
    %c0_7 = arith.constant 0 : index
    %c0_8 = arith.constant 0 : index
    %5 = vector.load %arg8[%c0_7, %c0_8] : memref<1x128xf32, #tpu.memory_space<vmem>>, vector<1x128xf32>
    %6 = vector.broadcast %5 : vector<1x128xf32> to vector<16x128xf32>
    %7 = arith.addf %4, %6 : vector<16x128xf32>
    %8 = vector.shape_cast %7 : vector<16x128xf32> to vector<1x16x128xf32>
    %9 = arith.truncf %8 : vector<1x16x128xf32> to vector<1x16x128xbf16>
    %c0_9 = arith.constant 0 : index
    %c0_10 = arith.constant 0 : index
    %c0_11 = arith.constant 0 : index
    %10 = vector.load %arg2[%c0_9, %c0_10, %c0_11] : memref<1x16x16xbf16, #tpu.memory_space<vmem>>, vector<1x16x16xbf16>
    "tpu.trace_start"() <{level = 10 : i32, message = "bls,bsh->blh"}> : () -> ()
    %cst_12 = arith.constant dense<0.000000e+00> : vector<1x16x128xf32>
    %11 = tpu.matmul %10, %9, %cst_12 {dimension_numbers = #tpu.dot_dimension_numbers<[2], [1], [1], [2], [0, 0, 0, 1, 1, 2], [0], [0]>} : vector<1x16x16xbf16>, vector<1x16x128xbf16>, vector<1x16x128xf32> -> vector<1x16x128xf32>
    "tpu.trace_stop"() : () -> ()
    %cst_13 = arith.constant 0.000000e+00 : f32
    %12 = vector.broadcast %cst_13 : f32 to vector<1x16x128xf32>
    %13 = arith.maximumf %11, %12 : vector<1x16x128xf32>
    %14 = arith.truncf %13 : vector<1x16x128xf32> to vector<1x16x128xbf16>
    %cst_14 = arith.constant 1.000000e+00 : f32
    %15 = vector.broadcast %cst_14 : f32 to vector<1x1x1xf32>
    %16 = arith.maximumf %0, %15 : vector<1x1x1xf32>
    %17 = arith.extf %14 : vector<1x16x128xbf16> to vector<1x16x128xf32>
    %cst_15 = arith.constant dense<0.000000e+00> : vector<1x128xf32>
    %18 = vector.multi_reduction <add>, %17, %cst_15 [1] : vector<1x16x128xf32> to vector<1x128xf32>
    %19 = vector.shape_cast %18 : vector<1x128xf32> to vector<1x1x128xf32>
    %20 = vector.broadcast %16 : vector<1x1x1xf32> to vector<1x1x128xf32>
    %21 = arith.divf %19, %20 : vector<1x1x128xf32>
    %22 = vector.shape_cast %21 : vector<1x1x128xf32> to vector<1x128xf32>
    %23 = arith.truncf %22 : vector<1x128xf32> to vector<1x128xbf16>
    %c0_16 = arith.constant 0 : index
    %c0_17 = arith.constant 0 : index
    %24 = vector.load %arg9[%c0_16, %c0_17] : memref<128x128xbf16, #tpu.memory_space<vmem>>, vector<128x128xbf16>
    %cst_18 = arith.constant dense<0.000000e+00> : vector<1x128xf32>
    %25 = tpu.matmul %23, %24, %cst_18 {dimension_numbers = #tpu.dot_dimension_numbers<[1], [0], [0], [1], [0, 0, 1, 1], [], []>} : vector<1x128xbf16>, vector<128x128xbf16>, vector<1x128xf32> -> vector<1x128xf32>
    %c0_19 = arith.constant 0 : index
    %c0_20 = arith.constant 0 : index
    %26 = vector.load %arg5[%c0_19, %c0_20] : memref<8x128xf32, #tpu.memory_space<vmem>>, vector<8x128xf32>
    %c0_21 = arith.constant 0 : index
    %c0_22 = arith.constant 0 : index
    %27 = vector.load %arg6[%c0_21, %c0_22] : memref<8x1xf32, #tpu.memory_space<vmem>>, vector<8x1xf32>
    %28 = vector.shape_cast %25 : vector<1x128xf32> to vector<1x1x128xf32>
    %29 = vector.shape_cast %27 : vector<8x1xf32> to vector<1x8x1xf32>
    %30 = vector.broadcast %29 : vector<1x8x1xf32> to vector<1x8x128xf32>
    %31 = vector.broadcast %28 : vector<1x1x128xf32> to vector<1x8x128xf32>
    %32 = arith.mulf %30, %31 : vector<1x8x128xf32>
    %33 = vector.shape_cast %26 : vector<8x128xf32> to vector<1x8x128xf32>
    %34 = arith.addf %33, %32 : vector<1x8x128xf32>
    %cst_23 = arith.constant 0.000000e+00 : f32
    %35 = vector.broadcast %cst_23 : f32 to vector<1x8x128xf32>
    %36 = arith.maximumf %34, %35 : vector<1x8x128xf32>
    %cst_24 = arith.constant 0.176776692 : f32
    %37 = vector.broadcast %cst_24 : f32 to vector<1x8x128xf32>
    %38 = arith.mulf %36, %37 : vector<1x8x128xf32>
    %39 = arith.truncf %38 : vector<1x8x128xf32> to vector<1x8x128xbf16>
    "tpu.trace_start"() <{level = 10 : i32, message = "bch,blh->bcl"}> : () -> ()
    %cst_25 = arith.constant dense<0.000000e+00> : vector<1x8x16xf32>
    %40 = tpu.matmul %39, %14, %cst_25 {dimension_numbers = #tpu.dot_dimension_numbers<[2], [2], [1], [1], [0, 0, 0, 1, 1, 1], [0], [0]>} : vector<1x8x128xbf16>, vector<1x16x128xbf16>, vector<1x8x16xf32> -> vector<1x8x16xf32>
    "tpu.trace_stop"() : () -> ()
    %41 = tpu.iota {dimensions = array<i32: 2>} : vector<1x1x16xi32>
    %42 = arith.sitofp %41 : vector<1x1x16xi32> to vector<1x1x16xf32>
    %43 = vector.broadcast %0 : vector<1x1x1xf32> to vector<1x1x16xf32>
    %44 = arith.cmpf olt, %42, %43 : vector<1x1x16xf32>
    %cst_26 = arith.constant 0.000000e+00 : f32
    %cst_27 = arith.constant -1.000000e+09 : f32
    %45 = vector.broadcast %cst_26 : f32 to vector<1x1x16xf32>
    %46 = vector.broadcast %cst_27 : f32 to vector<1x1x16xf32>
    %47 = arith.select %44, %45, %46 : vector<1x1x16xi1>, vector<1x1x16xf32>
    %48 = vector.broadcast %47 : vector<1x1x16xf32> to vector<1x8x16xf32>
    %49 = arith.addf %40, %48 : vector<1x8x16xf32>
    %cst_28 = arith.constant dense<0xFF800000> : vector<1x8xf32>
    %50 = vector.multi_reduction <maximumf>, %49, %cst_28 [2] : vector<1x8x16xf32> to vector<1x8xf32>
    %51 = vector.shape_cast %50 : vector<1x8xf32> to vector<1x8x1xf32>
    %52 = vector.broadcast %51 : vector<1x8x1xf32> to vector<1x8x16xf32>
    %53 = arith.subf %49, %52 : vector<1x8x16xf32>
    %54 = math.exp %53 : vector<1x8x16xf32>
    %cst_29 = arith.constant dense<0.000000e+00> : vector<1x8xf32>
    %55 = vector.multi_reduction <add>, %54, %cst_29 [2] : vector<1x8x16xf32> to vector<1x8xf32>
    %56 = vector.shape_cast %55 : vector<1x8xf32> to vector<1x8x1xf32>
    %57 = tpu.reciprocal %56 {approx = true} : vector<1x8x1xf32> -> vector<1x8x1xf32>
    %58 = vector.broadcast %57 : vector<1x8x1xf32> to vector<1x8x16xf32>
    %59 = arith.mulf %54, %58 : vector<1x8x16xf32>
    %60 = arith.truncf %59 : vector<1x8x16xf32> to vector<1x8x16xbf16>
    "tpu.trace_start"() <{level = 10 : i32, message = "bcl,blh->bch"}> : () -> ()
    %cst_30 = arith.constant dense<0.000000e+00> : vector<1x8x128xf32>
    %61 = tpu.matmul %60, %14, %cst_30 {dimension_numbers = #tpu.dot_dimension_numbers<[2], [1], [1], [2], [0, 0, 0, 1, 1, 2], [0], [0]>} : vector<1x8x16xbf16>, vector<1x16x128xbf16>, vector<1x8x128xf32> -> vector<1x8x128xf32>
    "tpu.trace_stop"() : () -> ()
    %62 = arith.mulf %61, %36 : vector<1x8x128xf32>
    %c0_31 = arith.constant 0 : index
    %c0_32 = arith.constant 0 : index
    %63 = vector.load %arg10[%c0_31, %c0_32] : memref<1x128xf32, #tpu.memory_space<vmem>>, vector<1x128xf32>
    %64 = vector.shape_cast %63 : vector<1x128xf32> to vector<1x1x128xf32>
    %65 = vector.broadcast %64 : vector<1x1x128xf32> to vector<1x8x128xf32>
    %66 = arith.mulf %62, %65 : vector<1x8x128xf32>
    %cst_33 = arith.constant dense<0.000000e+00> : vector<1x8xf32>
    %67 = vector.multi_reduction <add>, %66, %cst_33 [2] : vector<1x8x128xf32> to vector<1x8xf32>
    %cst_34 = arith.constant 0.000000e+00 : f32
    %68 = vector.broadcast %cst_34 : f32 to vector<1x120xf32>
    %69 = tpu.concatenate %67, %68 in 1 : vector<1x8xf32>, vector<1x120xf32> -> vector<1x128xf32>
    %70 = vector.shape_cast %69 : vector<1x128xf32> to vector<1x1x128xf32>
    %c0_35 = arith.constant 0 : index
    %c0_36 = arith.constant 0 : index
    %c0_37 = arith.constant 0 : index
    %71 = vector.load %arg4[%c0_35, %c0_36, %c0_37] : memref<1x1x128xf32, #tpu.memory_space<vmem>>, vector<1x1x128xf32>
    %72 = arith.addf %70, %71 : vector<1x1x128xf32>
    %73 = arith.negf %72 : vector<1x1x128xf32>
    %74 = math.exp %73 : vector<1x1x128xf32>
    %cst_38 = arith.constant 1.000000e+00 : f32
    %75 = vector.broadcast %cst_38 : f32 to vector<1x1x128xf32>
    %76 = arith.addf %75, %74 : vector<1x1x128xf32>
    %77 = arith.divf %75, %76 : vector<1x1x128xf32>
    %c0_39 = arith.constant 0 : index
    %c0_40 = arith.constant 0 : index
    %c0_41 = arith.constant 0 : index
    %78 = vector.load %arg11[%c0_39, %c0_40, %c0_41] : memref<1x1x128xf32, #tpu.memory_space<vmem>>, vector<1x1x128xf32>
    tpu.vector_store %arg11[%c0_39, %c0_40, %c0_41], %77 {strides = array<i32>} : memref<1x1x128xf32, #tpu.memory_space<vmem>>, vector<1x1x128xf32>,
    return
  }
  func.func @transform_0(%arg0: i32) -> (i32, i32, i32) {
    %c0_i32 = arith.constant 0 : i32
    %c0_i32_0 = arith.constant 0 : i32
    %c0_i32_1 = arith.constant 0 : i32
    return %arg0, %c0_i32, %c0_i32_0 : i32, i32, i32
  }
  func.func @transform_1(%arg0: i32) -> (i32, i32, i32) {
    %c0_i32 = arith.constant 0 : i32
    %c0_i32_0 = arith.constant 0 : i32
    %c0_i32_1 = arith.constant 0 : i32
    return %arg0, %c0_i32, %c0_i32_0 : i32, i32, i32
  }
  func.func @transform_2(%arg0: i32) -> (i32, i32, i32) {
    %c0_i32 = arith.constant 0 : i32
    %c0_i32_0 = arith.constant 0 : i32
    %c0_i32_1 = arith.constant 0 : i32
    return %arg0, %c0_i32, %c0_i32_0 : i32, i32, i32
  }
  func.func @transform_3(%arg0: i32) -> (i32, i32, i32) {
    %c0_i32 = arith.constant 0 : i32
    %c0_i32_0 = arith.constant 0 : i32
    %c0_i32_1 = arith.constant 0 : i32
    return %arg0, %c0_i32, %c0_i32_0 : i32, i32, i32
  }
  func.func @transform_4(%arg0: i32) -> (i32, i32) {
    %c0_i32 = arith.constant 0 : i32
    %c0_i32_0 = arith.constant 0 : i32
    %c0_i32_1 = arith.constant 0 : i32
    return %c0_i32, %c0_i32_0 : i32, i32
  }
  func.func @transform_5(%arg0: i32) -> (i32, i32) {
    %c0_i32 = arith.constant 0 : i32
    %c0_i32_0 = arith.constant 0 : i32
    %c0_i32_1 = arith.constant 0 : i32
    return %c0_i32, %c0_i32_0 : i32, i32
  }
  func.func @transform_6(%arg0: i32) -> (i32, i32) {
    %c0_i32 = arith.constant 0 : i32
    %c0_i32_0 = arith.constant 0 : i32
    %c0_i32_1 = arith.constant 0 : i32
    return %c0_i32, %c0_i32_0 : i32, i32
  }
  func.func @transform_7(%arg0: i32) -> (i32, i32) {
    %c0_i32 = arith.constant 0 : i32
    %c0_i32_0 = arith.constant 0 : i32
    %c0_i32_1 = arith.constant 0 : i32
    return %c0_i32, %c0_i32_0 : i32, i32
  }
  func.func @transform_8(%arg0: i32) -> (i32, i32) {
    %c0_i32 = arith.constant 0 : i32
    %c0_i32_0 = arith.constant 0 : i32
    %c0_i32_1 = arith.constant 0 : i32
    return %c0_i32, %c0_i32_0 : i32, i32
  }
  func.func @transform_9(%arg0: i32) -> (i32, i32) {
    %c0_i32 = arith.constant 0 : i32
    %c0_i32_0 = arith.constant 0 : i32
    %c0_i32_1 = arith.constant 0 : i32
    return %c0_i32, %c0_i32_0 : i32, i32
  }
  func.func @transform_10(%arg0: i32) -> (i32, i32, i32) {
    %c0_i32 = arith.constant 0 : i32
    %c0_i32_0 = arith.constant 0 : i32
    %c0_i32_1 = arith.constant 0 : i32
    return %arg0, %c0_i32, %c0_i32_0 : i32, i32, i32
  }
}

</mosaic_0001>

<bundles_post_ra>
// kernel: tpu_custom_call.1
= control target key start
LH: loop header
LB: loop body
LE: loop exit
PB: predicated region body
PF: predicated region fallthrough
CT: control target
= control target key end

     0   :  { %s1711_s0 = inlined_call_operand.hbm [shape: bf16[2,16,32], index: 0, kind: input, shape index: {}]   ;;  %s1712_s1 = inlined_call_operand.vmem [shape: bf16[2,16,16], index: 1, kind: input, shape index: {}]   ;;  %s1713_s2 = inlined_call_operand.vmem [shape: f32[2,1,1], index: 2, kind: input, shape index: {}]   ;;  %s1714_s3 = inlined_call_operand.vmem [shape: f32[2,1,128], index: 3, kind: input, shape index: {}]   ;;  %s1715_s4 = inlined_call_operand.hbm [shape: f32[8,128], index: 4, kind: input, shape index: {}]   ;;  %s1716_s5 = inlined_call_operand.vmem [shape: f32[8,1], index: 5, kind: input, shape index: {}]   ;;  %s1717_s6 = inlined_call_operand.vmem [shape: bf16[32,128], index: 6, kind: input, shape index: {}]   ;;  %s1718_s7 = inlined_call_operand.vmem [shape: f32[1,128], index: 7, kind: input, shape index: {}]   ;;  %s1719_s8 = inlined_call_operand.hbm [shape: bf16[128,128], index: 8, kind: input, shape index: {}]   ;;  %s1720_s9 = inlined_call_operand.vmem [shape: f32[1,128], index: 9, kind: input, shape index: {}]   ;;  %s1721_s10 = inlined_call_operand.hbm [shape: f32[2,1,128], index: 10, kind: output, shape index: {}]  }
   0x1   :  { %1733 = sst [smem:[#allocation17_spill]] %s1715_s4 }
   0x2   :  { %1734 = sst [smem:[#allocation18_spill]] %s1721_s10 }
   0x3   :  { %15 = vsyncpa [#allocation3], 0 }
   0x4   :  { %17 = vsyncpa [#allocation3 + $0x1], 0 }
   0x5   :  { %18 = vsyncpa [#allocation6], 0 }
   0x6   :  { %19 = vsyncpa [#allocation4], 0 }
   0x7   :  { %21 = vsyncpa [#allocation4 + $0x1], 0  ;;  %s1413_s13 = smov 0   ;;  %s1415_s14 = smov 0  }
   0x8   :  { %s1417_s15 = smov 0   ;;  %s1419_s16 = smov 0  }
   0x9 LB: > { %1735 = sst [smem:[#allocation12_spill]] %s1334_s13  ;;  %s1434_s17 = sadd.s32 4294967295, %s1346_s16   ;;  %s1346_s16 = sphi %s1419_s16, %s1760_s16   ;;  %s1342_s15 = sphi %s1417_s15, %s1762_s15   ;;  %s1338_s14 = sphi %s1415_s14, %s1764_s14   ;;  %s1334_s13 = sphi %s1413_s13, %s1763_s13  }
   0xa   : > { %1736 = sst [smem:[#allocation13_spill]] %s1342_s15  ;;  %s992_s18 = sadd.s32 4294967294, %s1346_s16  }
   0xb   : > { %s1438_s19 = sadd.s32 1, %s1346_s16   ;;  %s34_s20 = sadd.s32 1, %s1342_s15 }
   0xc   : > { %1737 = sst [smem:[#allocation14_spill]] %s1438_s19  ;;  %s31_s21 = ssub.s32 %s1346_s16, %s1438_s19 }
   0xd   : > { %p41_p0 = scmp.ne.s32.totalorder %s1342_s15, %s1338_s14  ;;  %p32_p1 = scmp.eq.s32.totalorder %s31_s21, 0 }
   0xe   : > { %p42_p2 = scmp.eq.s32.totalorder %s1346_s16, 0  ;;  %p47_p3 = scmp.ne.s32.totalorder %s1338_s14, %s1334_s13 }
   0xf   : > { %p1722_p4 = scmp.eq.s32.totalorder %s1434_s17, 0  ;;  %p275_p7 = scmp.eq.s32.totalorder %s1434_s17, 1 }
  0x10   : > { %s1450_s22 = scalar_select %p32_p1, %s1342_s15, %s34_s20  }
  0x11   : > { %p1452_p5 = por %p42_p2, %p41_p0  ;;  %p1458_p6 = por %p1722_p4, %p47_p3 }
  0x12   : > { %1738 = sst [smem:[#allocation15_spill]] %s1450_s22  ;;  %p281_p8 = scmp.eq.s32.totalorder %s992_s18, 1 }
  0x13   : > { %s1740_s24 = scalar_select %p1458_p6, 1, 0 }
  0x14   : > { %p993_p9 = scmp.ge.s32.totalorder %s1346_s16, 1  ;;  %p288_p10 = scmp.lt.s32.totalorder %s1346_s16, 3 }
  0x15   : > { %p1465_p11 = por %p275_p7, %p41_p0  ;;  %p1469_p12 = por %p281_p8, %p47_p3 }
  0x16   : > { %p1473_p13 = pnand %p993_p9, %p288_p10  ;;  %s1348_s28 = smov [#allocation5]  }
  0x17   : > { %s1741_s25 = scalar_select %p1465_p11, 1, 0 }
  0x18   : > { %s1742_s26 = scalar_select %p1469_p12, 1, 0 }
  0x19   : > { %s1744_s27 = scalar_select %p1473_p13, 1, 0 }
  0x1a   : > { %1743 = sst [smem:[#allocation16_spill]] %s1742_s26  ;;  %p1105_p2 = pneg %p1473_p13 }
  0x1b   : > { %s301_s29 = sshll.u32 %s1348_s28, 4  ;;  %p1122_p4 = scmp.lt.s32.totalorder %s1346_s16, 2  ;;  %s302_s29 = int_to_ptr.vmem [resolvable:$true] %s301_s29 }
  0x1c   : > { %p1745_p0 = scmp.eq.s32.totalorder %s1434_s17, 0  ;;  %s1349_s12 = smov [#allocation7]  }
  0x1d   : > { %p1489_p3 = pnand %p1122_p4, %p1452_p5  ;;  %s320_s18 = sshll.u32 %s1349_s12, 4  ;;  %s1493_s18 = int_to_ptr.vmem [resolvable:$true] %s320_s18 }
  0x1e   : > { %p1483_p7 = pnand %p1105_p2, %p1745_p0  ;;  %s1748_s4 = sld [smem:[#allocation17_spill]] }
  0x1f   : > { %s1747_s11 = scalar_select %p1489_p3, 1, 0 }
  0x20   : > { %p1192_p9 = pneg %p1483_p7 }
  0x24   : > { %s1190_s28 = scalar_lea.hbm %s1748_s4, 128 }
  0x25   : > { %p1191_p8 = scmp.ne.s32.totalorder %s1748_s4, %s1190_s28  ;;  %p1197_p10 = scmp.lt.u32.totalorder %s1190_s28, %s1748_s4 }
  0x27   : > { %p1193_p4 = pnand %p1192_p9, %p1191_p8 }
  0x29   : > { %p1194_p5 = pneg %p1193_p4 }
  0x2b   : > { %p1199_p2 = pnand %p1197_p10, %p1194_p5 }
  0x2d   : > { %1202 = shalt.err (!%p1199_p2)
}
  0x2e   : > { %s1203_s12 = scalar_lea.vmem %s302_s29, 128  ;;  %p1211_p11 = scmp.lt.s32.totalorder %s302_s29, %s302_s29 }
  0x2f   : > { %p1204_p0 = scmp.ne.s32.totalorder %s302_s29, %s1203_s12  ;;  %p1212_p6 = scmp.lt.s32.totalorder %s1203_s12, %s1203_s12 }
  0x31   : > { %p1206_p1 = pnand %p1204_p0, %p1192_p9  ;;  %p1213_p13 = por %p1212_p6, %p1211_p11 }
  0x33   : > { %p1207_p12 = pneg %p1206_p1 }
  0x35   : > { %p1214_p3 = pnand %p1213_p13, %p1207_p12 }
  0x37   : > { %1217 = shalt.err (!%p1214_p3)
}
  0x38   : > { %1108 = dma.hbm_to_vmem [thread:$0]  (!%p1483_p7), %s1748_s4, 128, %s302_s29, [#allocation6]  }
  0x39   : > { %s337_s26 = sand.u32 1, %s1342_s15   ;;  %s1218_s28 = scalar_lea.hbm %s1719_s8, 1024 }
  0x3a   : > { %p1219_p1 = scmp.ne.s32.totalorder %s1719_s8, %s1218_s28  ;;  %p1225_p12 = scmp.lt.u32.totalorder %s1218_s28, %s1719_s8 }
  0x3c   : > { %p1221_p6 = pnand %p1219_p1, %p1192_p9 }
  0x3e   : > { %p1222_p11 = pneg %p1221_p6 }
  0x40   : > { %p1227_p13 = pnand %p1225_p12, %p1222_p11 }
  0x42   : > { %1230 = shalt.err (!%p1227_p13)
}
  0x43   : > { %s1231_s29 = scalar_lea.vmem %s1493_s18, 1024  ;;  %p1239_p5 = scmp.lt.s32.totalorder %s1493_s18, %s1493_s18 }
  0x44   : > { %p1232_p3 = scmp.ne.s32.totalorder %s1493_s18, %s1231_s29  ;;  %p1240_p10 = scmp.lt.s32.totalorder %s1231_s29, %s1231_s29 }
  0x46   : > { %p1234_p8 = pnand %p1232_p3, %p1192_p9  ;;  %p1241_p2 = por %p1240_p10, %p1239_p5 }
  0x48   : > { %p1235_p4 = pneg %p1234_p8 }
  0x4a   : > { %p1242_p0 = pnand %p1241_p2, %p1235_p4 }
  0x4c   : > { %1245 = shalt.err (!%p1242_p0)
}
  0x4d   : > { %s1350_s10 = smov 64   ;;  %s1351_s13 = smov 4  }
  0x4e   : > { %1111 = dma.hbm_to_vmem [thread:$0]  (!%p1483_p7), %s1719_s8, 1024, %s1493_s18, [#allocation6], %s1350_s10, %s1350_s10, %s1351_s13  }
  0x4f   : > { %s997_s20 = sshll.u32 %s337_s26, 3  ;;  %s1027_s21 = sshll.u32 %s1346_s16, 7 }
  0x50   : > { %s1550_s12 = scalar_lea.hbm %s1711_s0, %s1027_s21  ;;  %s341_s29 = scalar_lea.vmem [#allocation2], %s997_s20 }
  0x51   : > { %s348_s30 = sshll.u32 %s341_s29, 4  ;;  %s1554_s4 = scalar_lea.sflag [#allocation3], %s337_s26  ;;  %s1552_s30 = int_to_ptr.vmem [resolvable:$true] %s348_s30 }
  0x52   : > { %s1246_s15 = scalar_lea.hbm %s1550_s12, 128  ;;  %p1749_p7 = scmp.ne.s32.totalorder %s1747_s11, 0 }
  0x53   : > { %p1247_p9 = scmp.ne.s32.totalorder %s1550_s12, %s1246_s15  ;;  %s1251_s22 = scalar_lea.hbm %s1711_s0, 256 }
  0x54   : > { %p1248_p1 = pneg %p1749_p7  ;;  %p1252_p12 = scmp.lt.u32.totalorder %s1550_s12, %s1711_s0 }
  0x55   : > { %p1253_p13 = scmp.lt.u32.totalorder %s1251_s22, %s1246_s15  ;;  %p1255_p8 = scmp.lt.u32.totalorder %s1246_s15, %s1550_s12 }
  0x56   : > { %p1249_p6 = pnand %p1248_p1, %p1247_p9 }
  0x57   : > { %p1254_p3 = por %p1253_p13, %p1252_p12 }
  0x58   : > { %p1250_p11 = pneg %p1249_p6 }
  0x59   : > { %p1256_p4 = por %p1255_p8, %p1254_p3 }
  0x5b   : > { %p1257_p5 = pnand %p1256_p4, %p1250_p11 }
  0x5d   : > { %1260 = shalt.err (!%p1257_p5)
}
  0x5e   : > { %s1261_s26 = scalar_lea.vmem %s1552_s30, 128  ;;  %s1352_s20 = smov [#allocation2]  }
  0x5f   : > { %p1262_p10 = scmp.ne.s32.totalorder %s1552_s30, %s1261_s26  ;;  %s1266_s23 = sshll.u32 %s1352_s20, 4  ;;  %s1267_s23 = int_to_ptr.vmem [resolvable:$false] %s1266_s23 }
  0x60   : > { %s1268_s29 = scalar_lea.vmem %s1267_s23, 256  ;;  %p1269_p9 = scmp.lt.s32.totalorder %s1552_s30, %s1267_s23 }
  0x61   : > { %p1264_p2 = pnand %p1262_p10, %p1248_p1  ;;  %p1270_p6 = scmp.lt.s32.totalorder %s1268_s29, %s1261_s26 }
  0x63   : > { %p1265_p0 = pneg %p1264_p2  ;;  %p1271_p12 = por %p1270_p6, %p1269_p9 }
  0x65   : > { %p1272_p13 = pnand %p1271_p12, %p1265_p0 }
  0x67   : > { %1275 = shalt.err (!%p1272_p13)
}
  0x68   : > { %1115 = dma.hbm_to_vmem [thread:$0]  (!%p1749_p7), %s1550_s12, 128, %s1552_s30, %s1554_s4, %s1350_s10, %s1350_s10, %s1351_s13  }
  0x69   : > { %p1750_p1 = scmp.ne.s32.totalorder %s1744_s27, 0 }
  0x6a   : > { %s1588_s15 = sand.u32 (!%p1750_p1), 1, %s1338_s14   ;;  %p1751_p11 = scmp.ne.s32.totalorder (!%p1750_p1), %s1740_s24, 0 }
  0x6b   : > { %380 = sbr.rel (%p1750_p1) target bundleno = 1744 (0x6d0), region = 60  ;;  %s1001_s18 = sshll.u32 (!%p1750_p1), %s1588_s15, 3 }
  0x6c   : > { %s383_s19 = scalar_lea.sflag (!%p1750_p1), [#allocation3], %s1588_s15  ;;  %s386_s22 = scalar_lea.vmem (!%p1750_p1), [#allocation2], %s1001_s18 }
  0x72   : > { %1321 = dma.done.wait (%p1751_p11), %s383_s19, 128  }
  0x73   : > { %1323 = vsyncadd (%p1751_p11), %s383_s19, 4294967168  ;;  %p1752_p3 = scmp.eq.s32.totalorder %s1434_s17, 0 }
  0x75   : > { %1325 = dma.done.wait (%p1752_p3), [#allocation6], 1152   ;;  %p1753_p7 = pmov %p1752_p3 }
  0x76   : > { %v1353_v0 = vmov 0.0   ;;  %vm1354_vm0 = vmmov 0   ;;  %v1168_v1 = vld [vmem:[%s1717_s6] sm:$0xff]   ;;  %v1169_v2 = vld [vmem:[%s1717_s6 + $0x8] sm:$0xff]   ;;  %vm484_vm1 = vcmask 261120   ;;  %p441_p8 = scmp.lt.s32.totalorder %s1434_s17, 1  ;;  %v600_v25 = vlaneseq }
  0x77   : > { %1327 = vsyncadd (%p1753_p7), [#allocation6], 4294966144  ;;  %1047 = vmatprep.subr.bf16.mxu0 %v1353_v0  ;;  %1051 = vmatprep.mubr.msk.bf16.mxu0 %vm1354_vm0, %v1353_v0  ;;  %v1170_v3 = vld [vmem:[%s386_s22] sm:$0xff]   ;;  %v1172_v4 = vld [vmem:[#allocation7] sm:$0xff]   ;;  %v1355_v5 = vmov 0   ;;  %vm537_vm2 = vcmask 130048  }
  0x78   : > { %1061 = vmatprep.subr.bf16.mxu1 %v1353_v0  ;;  %1077 = vmatprep.mubr.msk.bf16.mxu1 %vm1354_vm0, %v1353_v0  ;;  %s1618_s10 = scalar_select %p441_p8, %s1434_s17, 1  ;;  %v712_v8 = vld [vmem:[%s1716_s5] sm:$0xff]  ;;  %v1174_v19 = vld [vmem:[#allocation7 + $0x10] sm:$0xff]   ;;  %v1175_v20 = vld [vmem:[#allocation7 + $0x18] sm:$0xff]   ;;  %v1645_v26 = vshrl.u32 %v600_v25, 7  ;;  %v728_v61 = vand.u32 127, %v600_v25 }
  0x79   : > { %1048 = vmatpush3.bf16.msra.mxu0 %v1168_v1  ;;  %1166 = vset.pattern.permute.xlu0 %v1355_v5  ;;  %v1006_v9 = vld [vmem:[%s1718_s7] ss:$0 sm:$0xff]  ;;  %v1176_v21 = vld [vmem:[#allocation7 + $0x20] sm:$0xff]   ;;  %v1178_v23 = vld [vmem:[#allocation7 + $0x30] sm:$0xff]   ;;  %vm853_vm4 = vcmask 64512   ;;  %s440_s12 = scalar_lea.vmem [#allocation8], %s1588_s15 }
  0x7a   : > { %1049 = vmatprep.subr.bf16.mxu0 %v1353_v0  ;;  %s1028_s13 = sshll.u32 %s1618_s10, 3  ;;  %s448_s20 = scalar_lea.vmem %s1713_s2, %s1618_s10  ;;  %1167 = vset.pattern.permute.xlu1 %v1355_v5  ;;  %v1173_v18 = vld [vmem:[#allocation7 + $0x8] sm:$0xff]   ;;  %v1179_v24 = vld [vmem:[#allocation7 + $0x38] sm:$0xff]   ;;  %v602_v30 = vsub.s32 0, %v1645_v26  ;;  %v729_v1 = vcvt.s32.f32 %v728_v61  ;;  %v850_v25 = vsub.s32 %v728_v61, %v1645_v26 }
  0x7b   : > { %s445_s21 = scalar_lea.vmem %s1712_s1, %s1028_s13  ;;  %v453_v6 = vld [vmem:[%s448_s20] sm:$0x1]  ;;  %1062 = vmatpush3.bf16.msra.mxu1 %v1172_v4  ;;  %v711_v53 = vld [vmem:[#allocation5] sm:$0xff]  ;;  %s451_s11 = scalar_lea.vmem %s1714_s3, %s1618_s10 }
  0x7c   : > { %v585_v7 = vmax.f32 %v453_v6, 1.0  ;;  %732 = vperm.xlu1 %1167, %v453_v6   ;;  %1063 = vmatprep.subr.bf16.mxu1 %v1353_v0  ;;  %v1171_v17 = vld [vmem:[%s445_s21] sm:$0xff]   ;;  %s1024_s13 = sshll.u32 %s1434_s17, 4  ;;  %s877_s30 = sshll.u32 %s440_s12, 4  ;;  %s1669_s30 = int_to_ptr.vmem [resolvable:$true] %s877_s30 }
  0x7d   : > { %1050 = vmatpush3.bf16.msra.mxu0 %v1169_v2  ;;  %v1177_v22 = vld [vmem:[#allocation7 + $0x28] sm:$0xff]   ;;  %v1356_v2 = vmov -1e+09   ;;  %s1754_s26 = sld [smem:[#allocation18_spill]]  ;;  %s865_s20 = scalar_lea.sflag [#allocation4], %s1588_s15 }
  0x7e   : > { %1055 = vmatprep.subr.bf16.mxu0 %v1353_v0  ;;  %597 = vperm.xlu0 %1166, %v585_v7   ;;  %s1276_s23 = scalar_lea.vmem %s1669_s30, 16  ;;  %p1755_p5 = scmp.ne.s32.totalorder %s1741_s25, 0 }
  0x7f   : > { %1064 = vmatpush3.bf16.msra.mxu1 %v1173_v18  ;;  %p1277_p4 = scmp.ne.s32.totalorder %s1669_s30, %s1276_s23  ;;  %s1357_s17 = smov [#allocation8]  }
  0x80   : > { %1052 = vmatmul.mubr.msk.bf16.vlgmr.msra.gmra.mrb[0].mxu0 %vm484_vm1, %v1170_v3  ;;  %1065 = vmatprep.subr.bf16.mxu1 %v1353_v0  ;;  %s1280_s29 = sshll.u32 %s1357_s17, 4  ;;  %s1281_s29 = int_to_ptr.vmem [resolvable:$false] %s1280_s29 }
  0x81   : > { %1057 = vmatprep.mubr.msk.bf16.mxu0 %vm1354_vm0, %v1353_v0  ;;  %p1278_p10 = pnand %p1277_p4, %p1755_p5  ;;  %s1282_s18 = scalar_lea.vmem %s1281_s29, 32 }
  0x82   : > { %715 = vperm.xlu0 %1166, %v712_v8   ;;  %p1283_p0 = scmp.lt.s32.totalorder %s1669_s30, %s1281_s29  ;;  %p1284_p9 = scmp.lt.s32.totalorder %s1282_s18, %s1276_s23 }
  0x83   : > { %1066 = vmatpush3.bf16.msra.mxu1 %v1174_v19  ;;  %v1022_v19 = vld [vmem:[%s1720_s9] ss:$0 sm:$0xff]  ;;  %s1667_s10 = scalar_lea.hbm %s1754_s26, %s1024_s13  ;;  %p1279_p2 = pneg %p1278_p10 }
  0x84   : > { %1067 = vmatprep.subr.bf16.mxu1 %v1353_v0  ;;  %p1285_p6 = por %p1284_p9, %p1283_p0 }
  0x86   : > { %p1286_p12 = pnand %p1285_p6, %p1279_p2 }
  0x87   : > { %1068 = vmatpush3.bf16.msra.mxu1 %v1175_v20 }
  0x88   : > { %1069 = vmatprep.subr.bf16.mxu1 %v1353_v0 }
  0x8b   : > { %1070 = vmatpush3.bf16.msra.mxu1 %v1176_v21 }
  0x8c   : > { %1071 = vmatprep.subr.bf16.mxu1 %v1353_v0 }
  0x8f   : > { %1072 = vmatpush3.bf16.msra.mxu1 %v1177_v22 }
  0x90   : > { %1073 = vmatprep.subr.bf16.mxu1 %v1353_v0 }
  0x93   : > { %1074 = vmatpush3.bf16.msra.mxu1 %v1178_v23 }
  0x94   : > { %1075 = vmatprep.subr.bf16.mxu1 %v1353_v0 }
  0x97   : > { %1076 = vmatpush3.bf16.msra.mxu1 %v1179_v24 }
  0xfb   : > { %v733_v62 = vpop.permute.xlu1 %732 }
  0xfc   : > { %v738_v63 = vrot.slane %v733_v62, %v602_v30 }
  0xfd   : > { %v598_v35 = vpop.permute.xlu0 %597 }
  0xfe   : > { %v603_v36 = vrot.slane %v598_v35, %v602_v30  ;;  %vm739_vm3 = vcmp.lt.f32.partialorder %v729_v1, %v738_v63 }
  0xff   : > { %v740_v3 = vsel %vm739_vm3, 0.0, %v1356_v2 }
 0x100   : > { %1180 = vrcp.f32 %v603_v36 }
 0x101   : > { %v716_v52 = vpop.permute.xlu0 %715 }
 0x10a   : > { %v1181_v45 = vpop.eup %1180 }
 0x153   : > { %v522_v10 = vpop.f32.mrb[0].mxu0 }
 0x154   : > { %v1053_v11 = vpop.f32.mrb[1].mxu0  ;;  %v523_v13 = vadd.f32 %v1006_v9, %v522_v10 }
 0x155   : > { %v525_v12 = vpop.f32.mrb[2].mxu0 }
 0x156   : > { %v526_v14 = vadd.f32 %v1006_v9, %v525_v12  ;;  %v1054_v15 = vpop.f32.mrb[3].mxu0 }
 0x158   : > { %v529_v16 = vpack.c.bf16 %v526_v14, %v523_v13 }
 0x15a   : > { %1056 = vmatpush3.bf16.msra.mxu0 %v529_v16 }
 0x15b   : > { %1081 = vmatprep.subr.bf16.mxu0 %v1353_v0 }
 0x15d   : > { %1058 = vmatmul.mubr.msk.bf16.vlgmr.msra.gmra.mrb[4].mxu0 %vm537_vm2, %v1171_v17 }
 0x15e   : > { %1083 = vmatprep.mubr.msk.bf16.mxu0 %vm1354_vm0, %v1353_v0 }
 0x230   : > { %v575_v27 = vpop.f32.mrb[4].mxu0 }
 0x231   : > { %v1059_v28 = vpop.f32.mrb[5].mxu0  ;;  %v582_v31 = vmax.f32 %v575_v27, 0.0 }
 0x232   : > { %v578_v29 = vpop.f32.mrb[6].mxu0  ;;  %v855_v28 = vld [vmem:[%s451_s11] sm:$0x1] }
 0x233   : > { %v583_v32 = vmax.f32 %v578_v29, 0.0  ;;  %v1060_v33 = vpop.f32.mrb[7].mxu0 }
 0x235   : > { %v584_v34 = vpack.c.bf16 %v583_v32, %v582_v31 }
 0x237   : > { %v586_v37 = vunpack.c.l.bf16 %v584_v34  ;;  %v587_v38 = vunpack.c.h.bf16 %v584_v34  ;;  %1082 = vmatpush3.bf16.xpose.msra.mxu0 %v584_v34 }
 0x238   : > { %1087 = vmatprep.subr.bf16.mxu0 %v1353_v0 }
 0x239   : > { %v588_v39 = vadd.f32 %v587_v38, %v586_v37 }
 0x23b   : > { %v589_v40 = vrot.slane %v588_v39, 4 }
 0x23d   : > { %v590_v41 = vadd.f32 %v589_v40, %v588_v39 }
 0x23f   : > { %v591_v42 = vrot.slane %v590_v41, 2 }
 0x241   : > { %v592_v43 = vadd.f32 %v591_v42, %v590_v41 }
 0x243   : > { %v593_v44 = vrot.slane %v592_v43, 1 }
 0x245   : > { %v594_v46 = vadd.f32 %v593_v44, %v592_v43 }
 0x247   : > { %v605_v47 = vmul.f32 %v1181_v45, %v594_v46 }
 0x249   : > { %v606_v48 = vpack.c.bf16 %v605_v47, %v605_v47 }
 0x24b   : > { %1078 = vmatmul.mubr.bf16.vlgmr.msra.gmra.mrb[0].mxu1 %v606_v48 }
 0x31e   : > { %v705_v49 = vpop.f32.mrb[0].mxu1 }
 0x31f   : > { %v721_v50 = vrot.slane %v705_v49, %v602_v30  ;;  %v1079_v51 = vpop.f32.mrb[1].mxu1 }
 0x320   : > { %v708_v54 = vpop.f32.mrb[2].mxu1 }
 0x321   : > { %v722_v55 = vmul.f32 %v721_v50, %v716_v52  ;;  %v1080_v56 = vpop.f32.mrb[3].mxu1 }
 0x323   : > { %v723_v57 = vadd.f32 %v722_v55, %v711_v53 }
 0x325   : > { %v724_v58 = vmax.f32 %v723_v57, 0.0 }
 0x327   : > { %v725_v59 = vmul.f32 0.17677669, %v724_v58 }
 0x329   : > { %v726_v60 = vpack.c.bf16 %v725_v59, %v725_v59 }
 0x32b   : > { %1084 = vmatmul.mubr.bf16.vlgmr.msra.gmra.mrb[8].mxu0 %v726_v60 }
 0x32c   : > { %1088 = vmatpush3.bf16.msra.mxu0 %v584_v34  ;;  %1089 = vmatprep.mubr.msk.bf16.mxu0 %vm1354_vm0, %v1353_v0 }
 0x3fe   : > { %v775_v4 = vpop.f32.mrb[8].mxu0 }
 0x3ff   : > { %v776_v5 = vadd.f32 %v775_v4, %v740_v3  ;;  %v1085_v6 = vpop.f32.mrb[9].mxu0 }
 0x400   : > { %v778_v7 = vpop.f32.mrb[10].mxu0 }
 0x401   : > { %v1086_v8 = vpop.f32.mrb[11].mxu0  ;;  %v781_v9 = vsel %vm537_vm2, %v776_v5, -inf }
 0x402   : > { %782 = vmax.xlane.f32.xlu1 %v781_v9 }
 0x48f   : > { %v783_v10 = vpop.xlane.xlu1 %782 }
 0x490   : > { %v784_v11 = vsub.f32 %v776_v5, %v783_v10 }
 0x492   : > { %v785_v12 = vmul.f32 1.442695, %v784_v11 }
 0x494   : > { %1182 = vpow2.f32 %v785_v12 }
 0x49e   : > { %v1183_v0 = vpop.eup %1182 }
 0x49f   : > { %v787_v13 = vsel %vm537_vm2, %v1183_v0, 0.0 }
 0x4a0   : > { %788 = vadd.xlane.f32.xlu0 %v787_v13 }
 0x52d   : > { %v789_v14 = vpop.xlane.xlu0 %788 }
 0x52e   : > { %1184 = vrcp.f32 %v789_v14 }
 0x538   : > { %v1185_v15 = vpop.eup %1184 }
 0x539   : > { %v791_v16 = vmul.f32 %v1185_v15, %v1183_v0 }
 0x53b   : > { %v792_v17 = vpack.c.bf16 %v791_v16, %v791_v16 }
 0x53d   : > { %1090 = vmatmul.mubr.msk.bf16.vlgmr.msra.gmra.mrb[12].mxu0 %vm537_vm2, %v792_v17 }
 0x610   : > { %v830_v18 = vpop.f32.mrb[12].mxu0 }
 0x611   : > { %v836_v20 = vmul.f32 %v830_v18, %v724_v58  ;;  %v1091_v21 = vpop.f32.mrb[13].mxu0 }
 0x612   : > { %v833_v22 = vpop.f32.mrb[14].mxu0 }
 0x613   : > { %v1092_v23 = vpop.f32.mrb[15].mxu0  ;;  %v844_v24 = vmul.f32 %v1022_v19, %v836_v20 }
 0x615   : > { %845 = vadd.xlane.f32.xlu0 %v844_v24 }
 0x6a2   : > { %v846_v27 = vpop.xlane.xlu0 %845 }
 0x6a3   : > { %v851_v29 = vrot.slane %v846_v27, %v850_v25 }
 0x6a5   : > { %v854_v30 = vsel %vm853_vm4, %v851_v29, 0.0 }
 0x6a6   : > { %v856_v31 = vadd.f32 %v855_v28, %v854_v30 }
 0x6a8   : > { %v1023_v32 = vmul.f32 -1.442695, %v856_v31 }
 0x6aa   : > { %1186 = vpow2.f32 %v1023_v32 }
 0x6b4   : > { %v1187_v33 = vpop.eup %1186 }
 0x6b5   : > { %v860_v34 = vadd.f32 1.0, %v1187_v33 }
 0x6b7   : > { %1188 = vrcp.f32 %v860_v34 }
 0x6c1   : > { %v1189_v26 = vpop.eup %1188 }
 0x6c2   : > { %863 = vst [vmem:[%s440_s12] sm:$0x1] %v1189_v26 }
 0x6c3   : > { %1289 = shalt.err (!%p1286_p12)
}
 0x6c4   : > { %s1290_s15 = scalar_lea.hbm %s1667_s10, 16  ;;  %s1294_s4 = scalar_lea.hbm %s1754_s26, 32 }
 0x6c5   : > { %p1291_p13 = scmp.ne.s32.totalorder %s1667_s10, %s1290_s15  ;;  %p1295_p3 = scmp.lt.u32.totalorder %s1667_s10, %s1754_s26 }
 0x6c6   : > { %p1296_p7 = scmp.lt.u32.totalorder %s1294_s4, %s1290_s15  ;;  %p1298_p4 = scmp.lt.u32.totalorder %s1290_s15, %s1667_s10 }
 0x6c7   : > { %p1292_p1 = pnand %p1291_p13, %p1755_p5 }
 0x6c8   : > { %p1297_p8 = por %p1296_p7, %p1295_p3 }
 0x6c9   : > { %p1293_p11 = pneg %p1292_p1 }
 0x6ca   : > { %p1299_p10 = por %p1298_p4, %p1297_p8 }
 0x6cc   : > { %p1300_p2 = pnand %p1299_p10, %p1293_p11 }
 0x6ce   : > { %1303 = shalt.err (!%p1300_p2)
}
 0x6cf   : > { %1103 = dma.vmem_to_hbm [thread:$0]  (%p1755_p5), %s1669_s30, 16, %s1667_s10, %s865_s20  }
 0x6d0 PF: > { %s1756_s11 = sld [smem:[#allocation12_spill]]  ;;  %s1757_s13 = sld [smem:[#allocation16_spill]] }
 0x6d1   : > { %p1759_p9 = scmp.ge.s32.totalorder %s1346_s16, 2 }
 0x6d6   : > { %s889_s12 = sand.u32 1, %s1756_s11   ;;  %p1758_p0 = scmp.ne.s32.totalorder %s1757_s13, 0 }
 0x6d7   : > { %s890_s21 = scalar_lea.sflag [#allocation4], %s889_s12 }
 0x6d8   : > { %p1117_p6 = pnand %p1759_p9, %p1758_p0 }
 0x6da   : > { %1329 = dma.done.wait (!%p1117_p6), %s890_s21, 16  }
 0x6db   : > { %1331 = vsyncadd (!%p1117_p6), %s890_s21, 4294967280  ;;  %s1760_s16 = sld [smem:[#allocation14_spill]]  ;;  %s1761_s28 = sld [smem:[#allocation13_spill]] }
 0x6dc   : > { %s1762_s15 = sld [smem:[#allocation15_spill]]  ;;  %s1763_s13 = smov %s1338_s14 }
 0x6e1   : > { %p24_p12 = scmp.ge.s32.totalorder %s1760_s16, 4   ;;  %s1764_s14 = smov %s1761_s28 }
 0x6e3   :  { %26 = sbr.rel (!%p24_p12) target bundleno = 9 (0x9), region = 122 }
 0x6ea   :  { %894 = vsyncpa [#allocation3], 1 }
 0x6eb   :  { %896 = vsyncpa [#allocation3 + $0x1], 1 }
 0x6ec   :  { %897 = vsyncpa [#allocation6], 1 }
 0x6ed   :  { %898 = vsyncpa [#allocation4], 1 }
 0x6ee   :  { %900 = vsyncpa [#allocation4 + $0x1], 1 }

</bundles_post_ra>
